<compile_context>
chip_gen: v6e
topology: v6e:2x2x1
jax: 0.10.0
libtpu: 0.0.40
codegen_flags: <defaults>
</compile_context>

<pallas_src>
import math

import jax
import jax.numpy as jnp
from jax.experimental import pallas as pl
from jax.experimental.pallas import tpu as pltpu


# -----------------------------------------------------------------------------
# Helpers
# -----------------------------------------------------------------------------
def _pick_tile(n, preferred):
    """Largest preferred tile that divides n; otherwise the largest divisor of n
    not exceeding the largest preference (bounds the VMEM working set even for
    awkward sequence lengths — review correctness concern)."""
    for t in preferred:
        if t <= n and n % t == 0:
            return t
    cap = min(n, max(preferred))
    for t in range(cap, 0, -1):
        if n % t == 0:
            return t
    return n


def _padded_bytes(shape, itemsize):
    """Rough VMEM footprint of one buffer: pad lane dim to 128, sublane dim to 8."""
    shape = list(shape)
    if len(shape) >= 1:
        shape[-1] = -(-shape[-1] // 128) * 128
    if len(shape) >= 2:
        shape[-2] = -(-shape[-2] // 8) * 8
    n = 1
    for s in shape:
        n *= int(s)
    return n * itemsize


def _vmem_budget(entries):
    """entries: (num_buffers, shape, itemsize).  Explicit VMEM budget so the
    kernel stays inside v7x's 64 MiB physical VMEM with headroom."""
    total = sum(nbuf * _padded_bytes(shape, isz) for nbuf, shape, isz in entries)
    total = int(total * 2)                      # headroom for compiler temporaries
    return max(16 * 1024 * 1024, min(total, 64 * 1024 * 1024))


def _const_spec(block_shape, index_map):
    """BlockSpec for a block whose index never changes (weights / biases):
    request single buffering to halve its VMEM residency.  Falls back to a
    plain BlockSpec if this JAX version does not take pipeline_mode."""
    try:
        return pl.BlockSpec(block_shape, index_map, pipeline_mode=pl.Buffered(1))
    except (TypeError, ValueError):
        return pl.BlockSpec(block_shape, index_map)


# -----------------------------------------------------------------------------
# Kernel 1: fused QKV projection  (x @ [Wq*scale | Wk | Wv] + [bq*scale|bk|bv])
# -----------------------------------------------------------------------------
def _qkv_proj_kernel(x_ref, wqkv_ref, bqkv_ref, qkv_ref):
    x = x_ref[...].astype(wqkv_ref.dtype)                  # bf16 MXU operand
    acc = jnp.dot(x, wqkv_ref[...], preferred_element_type=jnp.float32)
    qkv_ref[...] = (acc + bqkv_ref[...]).astype(qkv_ref.dtype)


# -----------------------------------------------------------------------------
# Kernel 2: flash attention (online softmax over KV tiles) + output projection
# -----------------------------------------------------------------------------
def _flash_attn_kernel(q_ref, k_ref, v_ref, wo_ref, bo_ref, out_ref,
                       m_sc, l_sc, acc_sc):
    ki = pl.program_id(1)

    @pl.when(ki == 0)
    def _init():
        m_sc[...] = jnp.full(m_sc.shape, -jnp.inf, jnp.float32)
        l_sc[...] = jnp.zeros(l_sc.shape, jnp.float32)
        acc_sc[...] = jnp.zeros(acc_sc.shape, jnp.float32)

    # Blocks arrive q-major straight from the fused-QKV layout (no HBM relayout
    # between stages); the head-major swap happens in VMEM on the XLU instead.
    q = jnp.swapaxes(q_ref[...], 0, 1)                     # (H, tq, d_kv), pre-scaled
    k = jnp.swapaxes(k_ref[...], 0, 1)                     # (H, tk, d_kv)
    v = jnp.swapaxes(v_ref[...], 0, 1)                     # (H, tk, d_kv)

    # Heads as the batch dim of a single MXU matmul, bf16 in / f32 out.
    s = jnp.einsum("hqd,hkd->hqk", q, k,
                   preferred_element_type=jnp.float32)     # (H, tq, tk)

    m_prev = m_sc[...]
    m_new = jnp.maximum(m_prev, s.max(axis=-1, keepdims=True))
    alpha = jnp.exp(m_prev - m_new)
    # TODO(synk): on v6e/v7x the exp / rescale path could run in bf16 and the
    # row-sum could be folded into the PV matmul; kept f32 + XLU sum so the
    # same kernel stays correct and fast on v5e (no bf16 VPU/EUP).
    p = jnp.exp(s - m_new)
    l_sc[...] = alpha * l_sc[...] + p.sum(axis=-1, keepdims=True)
    acc_sc[...] = alpha * acc_sc[...] + jnp.einsum(
        "hqk,hkd->hqd", p.astype(v.dtype), v,
        preferred_element_type=jnp.float32)                # (H, tq, d_kv)
    m_sc[...] = m_new

    @pl.when(ki == pl.num_programs(1) - 1)
    def _finalize():
        # Normalize with the EUP reciprocal instead of a per-element VPU divide.
        ctx = acc_sc[...] * pl.reciprocal(l_sc[...], approx=True)   # (H, tq, d_kv)
        # One-time relayout: heads onto the lane axis -> (tq, inner), so the
        # fused output projection is ONE matmul with contraction depth = inner
        # (fills the MXU K dim) instead of H depth-d_kv matmuls + cross-head sum.
        ctx_flat = jnp.concatenate(
            [ctx[h] for h in range(ctx.shape[0])], axis=-1)          # (tq, inner)
        out = jnp.dot(ctx_flat.astype(wo_ref.dtype), wo_ref[...],
                      preferred_element_type=jnp.float32)             # (tq, d_model)
        out_ref[...] = (out + bo_ref[...]).astype(out_ref.dtype)
    # TODO(synk): m_sc/l_sc could be stored lane-dense as (H, tq) to shave the
    # 128x lane padding on v7x; kept (H, tq, 1) (known-good layout) here.


# -----------------------------------------------------------------------------
# One-time weight preparation (hoisted out of the forward pass)
# -----------------------------------------------------------------------------
def prepare_attention_params(params, *, n_heads, d_kv, compute_dtype=jnp.bfloat16):
    """Fuse QKV weights, fold the 1/sqrt(d_kv) score scale into Q, and cast the
    MXU operands to bf16.  Call ONCE per model, not per forward."""
    wq, bq, wk, bk, wv, bv, wo, bo = params
    scale = 1.0 / math.sqrt(d_kv)
    wqkv = jnp.concatenate([wq * scale, wk, wv], axis=1).astype(compute_dtype)
    bqkv = jnp.concatenate([bq * scale, bk, bv], axis=1).astype(jnp.float32)
    wo_c = wo.astype(compute_dtype)            # (inner, d_model)
    bo_c = bo.astype(jnp.float32)              # (1, d_model)
    return wqkv, bqkv, wo_c, bo_c


# -----------------------------------------------------------------------------
# Forward wrapper
# -----------------------------------------------------------------------------
def attention_forward(hidden_states, prepared_params, *, n_heads, d_kv):
    """hidden_states: (B, S, d_model). Returns (B, S, d_model)."""
    B, S, d_model = hidden_states.shape
    inner = n_heads * d_kv
    qkv_width = 3 * inner
    wqkv, bqkv, wo, bo = prepared_params
    compute_dtype = wqkv.dtype
    out_dtype = hidden_states.dtype

    # --- stage 1: fused QKV projection --------------------------------------
    ts = _pick_tile(S, (512, 256, 128))
    stage1_vmem = _vmem_budget([
        (2, (ts, d_model), 4),                 # x blocks (f32 in VMEM)
        (1, (d_model, qkv_width), 2),          # wqkv (single-buffered, bf16)
        (1, (1, qkv_width), 4),                # bqkv (single-buffered)
        (2, (ts, qkv_width), 2),               # qkv out blocks (bf16)
    ])
    # TODO(synk): for very large d_model (>~2k) add a grid axis tiling 3*inner.
    qkv = pl.pallas_call(
        _qkv_proj_kernel,
        out_shape=jax.ShapeDtypeStruct((B, S, qkv_width), compute_dtype),
        grid_spec=pltpu.PrefetchScalarGridSpec(
            num_scalar_prefetch=0,
            grid=(B, S // ts),
            in_specs=[
                pl.BlockSpec((None, ts, d_model), lambda b, si: (b, si, 0)),
                _const_spec((d_model, qkv_width), lambda b, si: (0, 0)),
                _const_spec((1, qkv_width), lambda b, si: (0, 0)),
            ],
            out_specs=pl.BlockSpec((None, ts, qkv_width), lambda b, si: (b, si, 0)),
        ),
        compiler_params=pltpu.CompilerParams(
            dimension_semantics=("parallel", "parallel"),
            vmem_limit_bytes=stage1_vmem),
    )(hidden_states, wqkv, bqkv)

    # --- pure view (no data movement): (B, S, 3*inner) -> (B, S, 3, H, d_kv) --
    qkv5 = qkv.reshape(B, S, 3, n_heads, d_kv)

    # --- stage 2: flash attention + fused output projection -----------------
    tq = _pick_tile(S, (512, 256, 128))
    tk = _pick_tile(S, (512, 256, 128))
    nq = S // tq
    stage2_vmem = _vmem_budget([
        (2, (tq, n_heads, d_kv), 2),           # q blocks (bf16)
        (2, (tk, n_heads, d_kv), 2),           # k blocks
        (2, (tk, n_heads, d_kv), 2),           # v blocks
        (1, (inner, d_model), 2),              # wo (single-buffered, bf16)
        (1, (1, d_model), 4),                  # bo (single-buffered)
        (2, (tq, d_model), 4),                 # output blocks
        (1, (n_heads, tq, 1), 4),              # m scratch
        (1, (n_heads, tq, 1), 4),              # l scratch
        (1, (n_heads, tq, d_kv), 4),           # acc scratch
    ])
    out = pl.pallas_call(
        _flash_attn_kernel,
        out_shape=jax.ShapeDtypeStruct((B, S, d_model), out_dtype),
        grid_spec=pltpu.PrefetchScalarGridSpec(
            num_scalar_prefetch=0,
            # B and the q-tile index flattened into one "parallel" axis so the
            # two v7x TensorCores always get an even split; KV axis last.
            grid=(B * nq, S // tk),
            in_specs=[
                pl.BlockSpec((None, tq, None, n_heads, d_kv),
                             lambda g, ki: (g // nq, g % nq, 0, 0, 0)),
                pl.BlockSpec((None, tk, None, n_heads, d_kv),
                             lambda g, ki: (g // nq, ki, 1, 0, 0)),
                pl.BlockSpec((None, tk, None, n_heads, d_kv),
                             lambda g, ki: (g // nq, ki, 2, 0, 0)),
                _const_spec((inner, d_model), lambda g, ki: (0, 0)),
                _const_spec((1, d_model), lambda g, ki: (0, 0)),
            ],
            out_specs=pl.BlockSpec((None, tq, d_model),
                                   lambda g, ki: (g // nq, g % nq, 0)),
            scratch_shapes=[
                pltpu.VMEM((n_heads, tq, 1), jnp.float32),      # running max m
                pltpu.VMEM((n_heads, tq, 1), jnp.float32),      # running sum l
                pltpu.VMEM((n_heads, tq, d_kv), jnp.float32),   # accumulator
            ],
        ),
        compiler_params=pltpu.CompilerParams(
            dimension_semantics=("parallel", "arbitrary"),
            vmem_limit_bytes=stage2_vmem),
    )(qkv5, qkv5, qkv5, wo, bo)
    return out


# -----------------------------------------------------------------------------
# Pure-JAX reference matching the PyTorch forward (self-attn, eval mode, f32)
# -----------------------------------------------------------------------------
def _reference_forward(x, params, *, n_heads, d_kv):
    wq, bq, wk, bk, wv, bv, wo, bo = params
    B, S, _ = x.shape

    def shape(t):  # (B, S, inner) -> (B, H, S, d_kv)
        return t.reshape(B, S, n_heads, d_kv).transpose(0, 2, 1, 3)

    q = shape(x @ wq + bq[0])
    k = shape(x @ wk + bk[0])
    v = shape(x @ wv + bv[0])
    scores = jnp.einsum("bhqd,bhkd->bhqk", q, k) / math.sqrt(d_kv)
    w = jax.nn.softmax(scores, axis=-1)
    ctx = jnp.einsum("bhqk,bhkd->bhqd", w, v)
    ctx = ctx.transpose(0, 2, 1, 3).reshape(B, S, n_heads * d_kv)
    return ctx @ wo + bo[0]


if __name__ == "__main__":
    # Small config consistent with the module: d_model=32, num_heads=4, d_kv=8.
    B, S, d_model, n_heads, d_kv = 2, 8, 32, 4, 8
    inner_dim = n_heads * d_kv

    key = jax.random.PRNGKey(0)
    keys = jax.random.split(key, 9)
    w_scale = 0.02
    wq = w_scale * jax.random.normal(keys[0], (d_model, inner_dim), jnp.float32)
    bq = w_scale * jax.random.normal(keys[1], (1, inner_dim), jnp.float32)
    wk = w_scale * jax.random.normal(keys[2], (d_model, inner_dim), jnp.float32)
    bk = w_scale * jax.random.normal(keys[3], (1, inner_dim), jnp.float32)
    wv = w_scale * jax.random.normal(keys[4], (d_model, inner_dim), jnp.float32)
    bv = w_scale * jax.random.normal(keys[5], (1, inner_dim), jnp.float32)
    wo = w_scale * jax.random.normal(keys[6], (inner_dim, d_model), jnp.float32)
    bo = w_scale * jax.random.normal(keys[7], (1, d_model), jnp.float32)
    params = (wq, bq, wk, bk, wv, bv, wo, bo)

    hidden_states = jax.random.normal(keys[8], (B, S, d_model), jnp.float32)

    # Weight fusion / bf16 casts happen ONCE here, not inside the forward.
    prepared = prepare_attention_params(params, n_heads=n_heads, d_kv=d_kv)

    out = attention_forward(hidden_states, prepared, n_heads=n_heads, d_kv=d_kv)
    out = jax.block_until_ready(out)

    ref = _reference_forward(hidden_states, params, n_heads=n_heads, d_kv=d_kv)
    assert out.shape == (B, S, d_model)
    # Tolerance accounts for the intentional bf16 MXU operands and the approx
    # EUP reciprocal; genuine bugs would show errors orders of magnitude larger.
    assert jnp.allclose(out, ref, atol=3e-3, rtol=3e-2), "mismatch vs reference"

    print("KERNEL_OK")
</pallas_src>

<mosaic_0001>
module attributes {stable_mosaic.version = 11 : i64} {
  func.func @_qkv_proj_kernel(%arg0: i32, %arg1: i32, %arg2: memref<1x8x32xf32, #tpu.memory_space<vmem>>, %arg3: memref<32x96xbf16, #tpu.memory_space<vmem>>, %arg4: memref<1x96xf32, #tpu.memory_space<vmem>>, %arg5: memref<1x8x96xbf16, #tpu.memory_space<vmem>>) attributes {dimension_semantics = [#tpu.dimension_semantics<parallel>, #tpu.dimension_semantics<parallel>], iteration_bounds = array<i64: 2, 1>, scalar_prefetch = 0 : i64, scratch_operands = 0 : i64, tpu.core_type = #tpu.core_type<tc>, window_params = [{transform_indices = @transform_0, window_bounds = array<i64: 1, 8, 32>}, {pipeline_mode = #tpu.pipeline_mode<synchronous>, transform_indices = @transform_1, window_bounds = array<i64: 32, 96>}, {pipeline_mode = #tpu.pipeline_mode<synchronous>, transform_indices = @transform_2, window_bounds = array<i64: 1, 96>}, {transform_indices = @transform_3, window_bounds = array<i64: 1, 8, 96>}]} {
    %c0 = arith.constant 0 : index
    %c0_0 = arith.constant 0 : index
    %c0_1 = arith.constant 0 : index
    %0 = vector.load %arg2[%c0, %c0_0, %c0_1] : memref<1x8x32xf32, #tpu.memory_space<vmem>>, vector<1x8x32xf32>
    %1 = vector.shape_cast %0 : vector<1x8x32xf32> to vector<8x32xf32>
    %2 = arith.truncf %1 : vector<8x32xf32> to vector<8x32xbf16>
    %c0_2 = arith.constant 0 : index
    %c0_3 = arith.constant 0 : index
    %3 = vector.load %arg3[%c0_2, %c0_3] : memref<32x96xbf16, #tpu.memory_space<vmem>>, vector<32x96xbf16>
    %cst = arith.constant dense<0.000000e+00> : vector<8x96xf32>
    %4 = tpu.matmul %2, %3, %cst {dimension_numbers = #tpu.dot_dimension_numbers<[1], [0], [0], [1], [0, 0, 1, 1], [], []>} : vector<8x32xbf16>, vector<32x96xbf16>, vector<8x96xf32> -> vector<8x96xf32>
    %c0_4 = arith.constant 0 : index
    %c0_5 = arith.constant 0 : index
    %5 = vector.load %arg4[%c0_4, %c0_5] : memref<1x96xf32, #tpu.memory_space<vmem>>, vector<1x96xf32>
    %6 = vector.broadcast %5 : vector<1x96xf32> to vector<8x96xf32>
    %7 = arith.addf %4, %6 : vector<8x96xf32>
    %8 = arith.truncf %7 : vector<8x96xf32> to vector<8x96xbf16>
    %c0_6 = arith.constant 0 : index
    %c0_7 = arith.constant 0 : index
    %c0_8 = arith.constant 0 : index
    %9 = vector.load %arg5[%c0_6, %c0_7, %c0_8] : memref<1x8x96xbf16, #tpu.memory_space<vmem>>, vector<1x8x96xbf16>
    %10 = vector.shape_cast %9 : vector<1x8x96xbf16> to vector<8x96xbf16>
    %11 = vector.shape_cast %8 : vector<8x96xbf16> to vector<1x8x96xbf16>
    tpu.vector_store %arg5[%c0_6, %c0_7, %c0_8], %11 {strides = array<i32>} : memref<1x8x96xbf16, #tpu.memory_space<vmem>>, vector<1x8x96xbf16>,
    return
  }
  func.func @transform_0(%arg0: i32, %arg1: i32) -> (i32, i32, i32) {
    %c0_i32 = arith.constant 0 : i32
    %c0_i32_0 = arith.constant 0 : i32
    return %arg0, %arg1, %c0_i32 : i32, i32, i32
  }
  func.func @transform_1(%arg0: i32, %arg1: i32) -> (i32, i32) {
    %c0_i32 = arith.constant 0 : i32
    %c0_i32_0 = arith.constant 0 : i32
    %c0_i32_1 = arith.constant 0 : i32
    return %c0_i32, %c0_i32_0 : i32, i32
  }
  func.func @transform_2(%arg0: i32, %arg1: i32) -> (i32, i32) {
    %c0_i32 = arith.constant 0 : i32
    %c0_i32_0 = arith.constant 0 : i32
    %c0_i32_1 = arith.constant 0 : i32
    return %c0_i32, %c0_i32_0 : i32, i32
  }
  func.func @transform_3(%arg0: i32, %arg1: i32) -> (i32, i32, i32) {
    %c0_i32 = arith.constant 0 : i32
    %c0_i32_0 = arith.constant 0 : i32
    return %arg0, %arg1, %c0_i32 : i32, i32, i32
  }
}

</mosaic_0001>

<bundles_post_ra>
// kernel: tpu_custom_call.1
= control target key start
LH: loop header
LB: loop body
LE: loop exit
PB: predicated region body
PF: predicated region fallthrough
CT: control target
= control target key end

     0   :  { %8 = vsyncpa [#allocation3], 0  ;;  %s855_s0 = inlined_call_operand.hbm [shape: f32[2,8,32], index: 0, kind: input, shape index: {}]   ;;  %s856_s1 = inlined_call_operand.hbm [shape: bf16[32,96], index: 1, kind: input, shape index: {}]   ;;  %s857_s2 = inlined_call_operand.vmem [shape: f32[1,96], index: 2, kind: input, shape index: {}]   ;;  %s858_s3 = inlined_call_operand.hbm [shape: bf16[2,8,96], index: 3, kind: output, shape index: {}]  }
   0x1   :  { %10 = vsyncpa [#allocation3 + $0x1], 0 }
   0x2   :  { %11 = vsyncpa [#allocation6], 0 }
   0x3   :  { %12 = vsyncpa [#allocation4], 0 }
   0x4   :  { %14 = vsyncpa [#allocation4 + $0x1], 0  ;;  %s672_s12 = smov 0   ;;  %s674_s13 = smov 0  }
   0x5   :  { %s676_s14 = smov 0   ;;  %s678_s15 = smov 0  }
   0x6   :  { %s680_s16 = smov 0   ;;  %s682_s17 = smov 0  }
   0x7 LB: > { %s396_s18 = sadd.s32 4294967295, %s643_s17   ;;  %s397_s19 = sadd.s32 4294967294, %s643_s17   ;;  %s643_s17 = sphi %s682_s17, %s20_s17   ;;  %s639_s16 = sphi %s680_s16, %s876_s16   ;;  %s635_s15 = sphi %s678_s15, %s875_s15   ;;  %s631_s14 = sphi %s676_s14, %s874_s14   ;;  %s627_s13 = sphi %s674_s13, %s873_s13   ;;  %s623_s12 = sphi %s672_s12, %s872_s12  }
   0x8   : > { %p54_p0 = scmp.ne.s32.totalorder %s627_s13, %s623_s12  ;;  %p706_p1 = scmp.eq.s32.totalorder %s396_s18, 0 }
   0x9   : > { %p710_p2 = scmp.eq.s32.totalorder %s396_s18, 1  ;;  %p128_p3 = scmp.eq.s32.totalorder %s397_s19, 1 }
   0xa   : > { %p716_p4 = por %p706_p1, %p54_p0  ;;  %p398_p5 = scmp.ge.s32.totalorder %s643_s17, 1 }
   0xb   : > { %p721_p6 = por %p128_p3, %p54_p0  ;;  %p135_p7 = scmp.lt.s32.totalorder %s643_s17, 3 }
   0xc   : > { %s862_s22 = scalar_select %p716_p4, 1, 0 }
   0xd   : > { %s863_s23 = scalar_select %p721_p6, 1, 0 }
   0xe   : > { %p726_p8 = pnand %p398_p5, %p135_p7  ;;  %s645_s25 = smov [#allocation5]  }
   0xf   : > { %s147_s26 = sshll.u32 %s645_s25, 4  ;;  %s32_s28 = sadd.s32 1, %s639_s16  ;;  %s148_s26 = int_to_ptr.vmem [resolvable:$true] %s147_s26 }
  0x10   : > { %p434_p9 = pneg %p726_p8  ;;  %s516_s29 = scalar_lea.vmem %s148_s26, 256 }
  0x11   : > { %p517_p13 = scmp.ne.s32.totalorder %s148_s26, %s516_s29  ;;  %p524_p5 = scmp.lt.s32.totalorder %s148_s26, %s148_s26 }
  0x12   : > { %p735_p11 = pnand %p434_p9, %p706_p1  ;;  %p525_p7 = scmp.lt.s32.totalorder %s516_s29, %s516_s29 }
  0x14   : > { %p507_p12 = pneg %p735_p11  ;;  %p526_p6 = por %p525_p7, %p524_p5 }
  0x16   : > { %p519_p0 = pnand %p517_p13, %p507_p12 }
  0x18   : > { %p520_p3 = pneg %p519_p0 }
  0x1a   : > { %p527_p4 = pnand %p526_p6, %p520_p3 }
  0x1c   : > { %530 = shalt.err (!%p527_p4)
}
  0x1d   : > { %s646_s30 = smov 64   ;;  %s647_s4 = smov 4  }
  0x1e   : > { %437 = dma.hbm_to_vmem [thread:$0]  (!%p735_p11), %s856_s1, 256, %s148_s26, [#allocation6], %s646_s30, %s646_s30, %s647_s4  }
  0x1f   : > { %p34_p6 = scmp.ge.s32.totalorder %s32_s28, 2  ;;  %s41_s7 = sadd.s32 1, %s631_s14 }
  0x20   : > { %p48_p4 = scmp.ne.s32.totalorder %s631_s14, %s627_s13  ;;  %p49_p9 = scmp.eq.s32.totalorder %s643_s17, 0 }
  0x21   : > { %s878_s28 = smov (%p34_p6, %s32_s28), 0  ;;  %p447_p0 = scmp.lt.s32.totalorder %s643_s17, 2 }
  0x22   : > { %p753_p12 = por %p49_p9, %p48_p4  ;;  %p759_p13 = por %p710_p2, %p48_p4 }
  0x23   : > { %s36_s10 = ssub.s32 %s639_s16, %s878_s28  ;;  %s164_s11 = sand.u32 1, %s631_s14  }
  0x24   : > { %p39_p11 = scmp.eq.s32.totalorder %s36_s10, 0  ;;  %s401_s18 = sshll.u32 %s164_s11, 3 }
  0x25   : > { %s402_s25 = sshll.u32 %s639_s16, 7  ;;  %s168_s30 = scalar_lea.vmem [#allocation2], %s401_s18 }
  0x26   : > { %s768_s19 = scalar_select %p39_p11, %s631_s14, %s41_s7  }
  0x27   : > { %s174_s29 = scalar_lea.hbm %s855_s0, %s402_s25  ;;  %s176_s4 = sshll.u32 %s168_s30, 4  ;;  %s177_s4 = int_to_ptr.vmem [resolvable:$true] %s176_s4 }
  0x28   : > { %p776_p2 = pnand %p447_p0, %p753_p12  ;;  %s165_s5 = scalar_lea.sflag [#allocation3], %s164_s11 }
  0x29   : > { %s544_s6 = scalar_lea.vmem %s177_s4, 128  ;;  %s648_s7 = smov [#allocation2]  }
  0x2a   : > { %p533_p3 = pneg %p776_p2  ;;  %p545_p5 = scmp.ne.s32.totalorder %s177_s4, %s544_s6 }
  0x2b   : > { %s549_s10 = sshll.u32 %s648_s7, 4  ;;  %s550_s10 = int_to_ptr.vmem [resolvable:$false] %s549_s10 }
  0x2c   : > { %p547_p7 = pnand %p545_p5, %p533_p3  ;;  %s551_s25 = scalar_lea.vmem %s550_s10, 256 }
  0x2d   : > { %p552_p4 = scmp.lt.s32.totalorder %s177_s4, %s550_s10  ;;  %p553_p9 = scmp.lt.s32.totalorder %s551_s25, %s544_s6 }
  0x2e   : > { %p548_p6 = pneg %p547_p7 }
  0x2f   : > { %p554_p11 = por %p553_p9, %p552_p4 }
  0x31   : > { %p555_p10 = pnand %p554_p11, %p548_p6 }
  0x33   : > { %558 = shalt.err (!%p555_p10)
}
  0x34   : > { %441 = dma.hbm_to_vmem [thread:$0]  (!%p776_p2), %s174_s29, 128, %s177_s4, %s165_s5  }
  0x35   : > { %185 = sbr.rel (%p726_p8) target bundleno = 281 (0x119), region = 32  ;;  %s787_s8 = sand.u32 (!%p726_p8), 1, %s627_s13  }
  0x36   : > { %s404_s11 = sshll.u32 (!%p726_p8), %s787_s8, 3  ;;  %s188_s18 = scalar_lea.sflag (!%p726_p8), [#allocation3], %s787_s8 }
  0x37   : > { %s191_s26 = scalar_lea.vmem (!%p726_p8), [#allocation2], %s404_s11  ;;  %p869_p12 = scmp.ne.s32.totalorder (!%p726_p8), %s862_s22, 0 }
  0x3a   : > { %610 = dma.done.wait (%p869_p12), %s188_s18, 128  }
  0x3b   : > { %612 = vsyncadd (%p869_p12), %s188_s18, 4294967168 }
  0x3c   : > { %614 = dma.done.wait (%p706_p1), [#allocation6], 256  }
  0x3d   : > { %616 = vsyncadd (%p706_p1), [#allocation6], 4294967040  ;;  %v649_v0 = vmov 0.0   ;;  %vm650_vm0 = vmmov 0   ;;  %v503_v1 = vld [vmem:[#allocation5 + $0x8] sm:$0xff]   ;;  %v504_v2 = vld [vmem:[#allocation5] sm:$0xff]  }
  0x3e   : > { %418 = vmatprep.subr.bf16.mxu0 %v649_v0  ;;  %422 = vmatprep.mubr.msk.bf16.mxu0 %vm650_vm0, %v649_v0  ;;  %v219_v3 = vld [vmem:[%s191_s26] sm:$0xff]  ;;  %vm244_vm1 = vcmask 261120   ;;  %s406_s22 = sshll.u32 %s787_s8, 2  ;;  %s412_s27 = sshll.u32 %s635_s15, 6  ;;  %vm289_vm2 = vcmask 781312  }
  0x3f   : > { %419 = vmatpush3.bf16.msra.mxu0 %v503_v1  ;;  %v220_v4 = vpack.c.bf16 %v219_v3, %v219_v3  ;;  %v407_v5 = vld [vmem:[%s857_s2] ss:$0 sm:$0xff]  ;;  %s217_s29 = scalar_lea.vmem [#allocation7], %s406_s22  ;;  %s807_s5 = scalar_lea.hbm %s858_s3, %s412_s27 }
  0x40   : > { %420 = vmatprep.subr.bf16.mxu0 %v649_v0  ;;  %s306_s30 = sshll.u32 %s217_s29, 4  ;;  %s292_s15 = scalar_lea.sflag [#allocation4], %s787_s8  ;;  %s809_s30 = int_to_ptr.vmem [resolvable:$true] %s306_s30 }
  0x41   : > { %s559_s6 = scalar_lea.vmem %s809_s30, 64  ;;  %s651_s7 = smov [#allocation7]  }
  0x42   : > { %p560_p1 = scmp.ne.s32.totalorder %s809_s30, %s559_s6  ;;  %s563_s10 = sshll.u32 %s651_s7, 4  ;;  %s564_s10 = int_to_ptr.vmem [resolvable:$false] %s563_s10 }
  0x43   : > { %421 = vmatpush3.bf16.msra.mxu0 %v504_v2  ;;  %s565_s25 = scalar_lea.vmem %s564_s10, 128  ;;  %p566_p0 = scmp.lt.s32.totalorder %s809_s30, %s564_s10 }
  0x44   : > { %p561_p8 = pnand %p560_p1, %p759_p13  ;;  %p567_p2 = scmp.lt.s32.totalorder %s565_s25, %s559_s6 }
  0x46   : > { %423 = vmatmul.mubr.msk.bf16.vlgmr.msra.gmra.mxu0 %vm244_vm1, %v220_v4  ;;  %p562_p10 = pneg %p561_p8  ;;  %p568_p3 = por %p567_p2, %p566_p0 }
  0x48   : > { %p569_p5 = pnand %p568_p3, %p562_p10 }
 0x106   : > { %v282_v6 = vpop.f32.mrf.mxu0 }
 0x107   : > { %v283_v7 = vadd.f32 %v407_v5, %v282_v6 }
 0x108   : > { %v424_v8 = vpop.f32.mrf.mxu0 }
 0x109   : > { %v288_v9 = vpack.c.bf16 %v283_v7, %v283_v7 }
 0x10a   : > { %v285_v10 = vpop.f32.mrf.mxu0 }
 0x10b   : > { %290 = vst.msk [vmem:[%s217_s29] sm:$0xf] %vm289_vm2, %v288_v9 }
 0x10c   : > { %v425_v11 = vpop.f32.mrf.mxu0 }
 0x10d   : > { %572 = shalt.err (!%p569_p5)
}
 0x10e   : > { %s573_s11 = scalar_lea.hbm %s807_s5, 64  ;;  %s577_s26 = scalar_lea.hbm %s858_s3, 128 }
 0x10f   : > { %p574_p7 = scmp.ne.s32.totalorder %s807_s5, %s573_s11  ;;  %p578_p9 = scmp.lt.s32.totalorder %s807_s5, %s858_s3 }
 0x110   : > { %p579_p11 = scmp.lt.s32.totalorder %s577_s26, %s573_s11 }
 0x111   : > { %p575_p6 = pnand %p574_p7, %p759_p13 }
 0x112   : > { %p580_p12 = por %p579_p11, %p578_p9 }
 0x113   : > { %p576_p4 = pneg %p575_p6 }
 0x115   : > { %p581_p1 = pnand %p580_p12, %p576_p4 }
 0x117   : > { %584 = shalt.err (!%p581_p1)
}
 0x118   : > { %432 = dma.vmem_to_hbm [thread:$0]  (%p759_p13), %s809_s30, 64, %s807_s5, %s292_s15  }
 0x119 PF: > { %s318_s20 = sand.u32 1, %s623_s12   ;;  %p870_p8 = scmp.ne.s32.totalorder %s863_s23, 0 }
 0x11a   : > { %p871_p10 = scmp.ge.s32.totalorder %s643_s17, 2  ;;  %s319_s27 = scalar_lea.sflag [#allocation4], %s318_s20 }
 0x11c   : > { %p443_p0 = pnand %p871_p10, %p870_p8 }
 0x11e   : > { %p444_p2 = pneg %p443_p0 }
 0x120   : > { %618 = dma.done.wait (%p444_p2), %s319_s27, 64  }
 0x121   : > { %620 = vsyncadd (%p444_p2), %s319_s27, 4294967232  ;;  %s20_s17 = sadd.s32 1, %s643_s17   ;;  %s872_s12 = smov %s627_s13 }
 0x122   : > { %p17_p3 = scmp.ge.s32.totalorder %s20_s17, 4   ;;  %s873_s13 = smov %s631_s14 }
 0x123   : > { %s874_s14 = smov %s768_s19  ;;  %s875_s15 = smov %s639_s16 }
 0x124   : > { %s876_s16 = smov %s878_s28  ;;  %19 = sbr.rel (!%p17_p3) target bundleno = 7 (0x7), region = 81 }
 0x129   :  { %324 = vsyncpa [#allocation3], 1 }
 0x12a   :  { %326 = vsyncpa [#allocation3 + $0x1], 1 }
 0x12b   :  { %327 = vsyncpa [#allocation6], 1 }
 0x12c   :  { %328 = vsyncpa [#allocation4], 1 }
 0x12d   :  { %330 = vsyncpa [#allocation4 + $0x1], 1 }

</bundles_post_ra>
